<compile_context>
chip_gen: v7x
topology: tpu7x:2x2x1
jax: 0.10.0
libtpu: 0.0.40
codegen_flags: <defaults>
</compile_context>

<pallas_src>
import jax
import jax.numpy as jnp
from jax.experimental import pallas as pl
from jax.experimental.pallas import tpu as pltpu


# ----------------------------------------------------------------------------
# Fused kernel: out = swish(swish(swish(x@W1+b1)@W2+b2)@W3+b3)
# x tile: (TM, D) f32 (cast to bf16 in-kernel); Wk: (D, D) bf16 (resident,
# single-buffered); bk: (1, D) f32.
# ----------------------------------------------------------------------------
def _mlp_kernel(x_ref, w1_ref, b1_ref, w2_ref, b2_ref, w3_ref, b3_ref, o_ref):
    def swish(h):
        # h * sigmoid(h) = h / (1 + exp(-h)): one EUP exp + approx EUP recip.
        return h * pl.reciprocal(1.0 + jnp.exp(-h), approx=True)

    x = x_ref[...].astype(jnp.bfloat16)          # VPU cast; input streams f32
    h = jnp.dot(x, w1_ref[...], preferred_element_type=jnp.float32)
    h = swish(h + b1_ref[...])
    h = jnp.dot(h.astype(jnp.bfloat16), w2_ref[...],
                preferred_element_type=jnp.float32)
    h = swish(h + b2_ref[...])
    h = jnp.dot(h.astype(jnp.bfloat16), w3_ref[...],
                preferred_element_type=jnp.float32)
    h = swish(h + b3_ref[...])
    o_ref[...] = h.astype(o_ref.dtype)


# ----------------------------------------------------------------------------
# Tiling / VMEM sizing helpers
# ----------------------------------------------------------------------------
def _round_up(x, n):
    return ((x + n - 1) // n) * n


def _pick_tm(m, requested=1024):
    """M-tile: multiple of 16, as large as `requested`, and (when the batch is
    big enough) small enough to give >= 2 grid steps for v7x megacore."""
    tm = _round_up(min(m, requested), 16)
    if m > 16 and pl.cdiv(m, tm) < 2:
        tm = _round_up(pl.cdiv(m, 2), 16)
    return max(16, tm)


def _vmem_cap_bytes():
    """~85% of this generation's physical VMEM per TensorCore."""
    try:
        return int(0.85 * pltpu.get_tpu_info().vmem_capacity_bytes)
    except Exception:
        return 54 << 20  # v7x-safe fallback (64 MiB physical)


def _vmem_limit_bytes(tm, s_dim, t_dim, out_bytes):
    bf16, f32 = 2, 4
    d = max(s_dim, t_dim)
    weights = (s_dim * s_dim + 2 * t_dim * t_dim) * bf16   # single-buffered
    biases = (s_dim + 2 * t_dim) * f32
    x_tiles = 2 * tm * s_dim * f32                          # double-buffered
    o_tiles = 2 * tm * t_dim * out_bytes                    # double-buffered
    interm = 4 * tm * d * f32                               # in-kernel temps
    total = int(1.3 * (weights + biases + x_tiles + o_tiles + interm)) + (4 << 20)
    return max(16 << 20, min(total, _vmem_cap_bytes()))


# ----------------------------------------------------------------------------
# Forward wrapper
# ----------------------------------------------------------------------------
def mlp_forward(params, s, *, tm_request=1024, out_dtype=jnp.bfloat16):
    """s: (M, s_dim) -> (M, t_dim), matching MLP.forward of the reference."""
    m, s_dim = s.shape
    t_dim = params["w3"].shape[1]
    assert params["w1"].shape == (s_dim, s_dim)
    # The PyTorch Sequential only composes when s_dim == t_dim.
    assert s_dim == t_dim, "MLP(s_dim, t_dim) requires s_dim == t_dim"

    tm = _pick_tm(m, tm_request)
    grid_m = pl.cdiv(m, tm)
    m_pad = grid_m * tm
    if m_pad != m:                       # pad last tile; sliced off below
        s = jnp.pad(s, ((0, m_pad - m), (0, 0)))

    out_bytes = jnp.dtype(out_dtype).itemsize
    flops = 2 * m_pad * (s_dim * s_dim + 2 * t_dim * t_dim)
    transcendentals = 2 * m_pad * (s_dim + 2 * t_dim)       # exp + approx recip
    bytes_accessed = (
        m_pad * s_dim * 4                                   # x (f32)
        + (s_dim * s_dim + 2 * t_dim * t_dim) * 2           # weights (bf16)
        + 3 * t_dim * 4                                     # biases (f32)
        + m_pad * t_dim * out_bytes                         # output
    )

    def _run(single_buffer_consts):
        if single_buffer_consts:
            def const_spec(shape):
                return pl.BlockSpec(shape, lambda i: (0, 0),
                                    pipeline_mode=pl.Buffered(1))
        else:
            def const_spec(shape):
                return pl.BlockSpec(shape, lambda i: (0, 0))

        return pl.pallas_call(
            _mlp_kernel,
            out_shape=jax.ShapeDtypeStruct((m_pad, t_dim), out_dtype),
            grid=(grid_m,),
            in_specs=[
                pl.BlockSpec((tm, s_dim), lambda i: (i, 0)),   # x tile (f32)
                const_spec((s_dim, s_dim)),                    # W1 (resident)
                const_spec((1, s_dim)),                        # b1
                const_spec((t_dim, t_dim)),                    # W2 (resident)
                const_spec((1, t_dim)),                        # b2
                const_spec((t_dim, t_dim)),                    # W3 (resident)
                const_spec((1, t_dim)),                        # b3
            ],
            out_specs=pl.BlockSpec((tm, t_dim), lambda i: (i, 0)),
            compiler_params=pltpu.CompilerParams(
                dimension_semantics=("parallel",),
                vmem_limit_bytes=_vmem_limit_bytes(tm, s_dim, t_dim, out_bytes),
            ),
            cost_estimate=pl.CostEstimate(
                flops=flops,
                transcendentals=transcendentals,
                bytes_accessed=bytes_accessed,
            ),
        )(
            s,
            params["w1"], params["b1"],
            params["w2"], params["b2"],
            params["w3"], params["b3"],
        )

    try:
        out = _run(single_buffer_consts=True)
    except Exception:
        # Fallback for environments where pl.Buffered(1) / pipeline_mode is
        # not accepted; default double-buffering is still correct.
        out = _run(single_buffer_consts=False)

    if m_pad != m:
        out = out[:m]
    return out


# ----------------------------------------------------------------------------
# Parameters (weights stored as (in, out) bf16, biases as (1, out) f32 so the
# forward path does no re-layout work).
# ----------------------------------------------------------------------------
def init_params(key, s_dim, t_dim):
    ks = jax.random.split(key, 6)
    scale = 0.05

    def w(k, din, dout):
        return (jax.random.normal(k, (din, dout), jnp.float32) * scale
                ).astype(jnp.bfloat16)

    def b(k, dout):
        return jax.random.normal(k, (1, dout), jnp.float32) * scale

    return {
        "w1": w(ks[0], s_dim, s_dim), "b1": b(ks[1], s_dim),
        "w2": w(ks[2], t_dim, t_dim), "b2": b(ks[3], t_dim),
        "w3": w(ks[4], t_dim, t_dim), "b3": b(ks[5], t_dim),
    }


def _reference_forward(params, s):
    """Pure-JAX f32 reference of the PyTorch MLP forward (for sanity check)."""
    h = s
    for wk, bk in (("w1", "b1"), ("w2", "b2"), ("w3", "b3")):
        h = h @ params[wk].astype(jnp.float32) + params[bk]
        h = h * jax.nn.sigmoid(h)
    return h


if __name__ == "__main__":
    s_dim = 128   # lane-dense feature width; MLP requires s_dim == t_dim
    t_dim = 128
    batch = 32    # -> TM=16, 2 grid steps (exercises resident weights + megacore)

    key = jax.random.PRNGKey(0)
    pkey, skey = jax.random.split(key)
    params = init_params(pkey, s_dim, t_dim)
    s = jax.random.normal(skey, (batch, s_dim), jnp.float32)

    out = mlp_forward(params, s)
    out = jax.block_until_ready(out)

    assert out.shape == (batch, t_dim), out.shape
    assert out.dtype == jnp.bfloat16, out.dtype
    ref = _reference_forward(params, s)
    err = jnp.max(jnp.abs(out.astype(jnp.float32) - ref))
    assert jnp.allclose(out.astype(jnp.float32), ref, rtol=5e-2, atol=5e-2), float(err)
    print("KERNEL_OK")
</pallas_src>

<mosaic_0001>
module attributes {stable_mosaic.version = 11 : i64} {
  func.func @_mlp_kernel(%arg0: i32, %arg1: memref<16x128xf32, #tpu.memory_space<vmem>>, %arg2: memref<128x128xbf16, #tpu.memory_space<vmem>>, %arg3: memref<1x128xf32, #tpu.memory_space<vmem>>, %arg4: memref<128x128xbf16, #tpu.memory_space<vmem>>, %arg5: memref<1x128xf32, #tpu.memory_space<vmem>>, %arg6: memref<128x128xbf16, #tpu.memory_space<vmem>>, %arg7: memref<1x128xf32, #tpu.memory_space<vmem>>, %arg8: memref<16x128xbf16, #tpu.memory_space<vmem>>) attributes {dimension_semantics = [#tpu.dimension_semantics<parallel>], iteration_bounds = array<i64: 2>, scalar_prefetch = 0 : i64, scratch_operands = 0 : i64, tpu.core_type = #tpu.core_type<tc>, window_params = [{transform_indices = @transform_0, window_bounds = array<i64: 16, 128>}, {pipeline_mode = #tpu.pipeline_mode<synchronous>, transform_indices = @transform_1, window_bounds = array<i64: 128, 128>}, {pipeline_mode = #tpu.pipeline_mode<synchronous>, transform_indices = @transform_2, window_bounds = array<i64: 1, 128>}, {pipeline_mode = #tpu.pipeline_mode<synchronous>, transform_indices = @transform_3, window_bounds = array<i64: 128, 128>}, {pipeline_mode = #tpu.pipeline_mode<synchronous>, transform_indices = @transform_4, window_bounds = array<i64: 1, 128>}, {pipeline_mode = #tpu.pipeline_mode<synchronous>, transform_indices = @transform_5, window_bounds = array<i64: 128, 128>}, {pipeline_mode = #tpu.pipeline_mode<synchronous>, transform_indices = @transform_6, window_bounds = array<i64: 1, 128>}, {transform_indices = @transform_7, window_bounds = array<i64: 16, 128>}]} {
    %c0 = arith.constant 0 : index
    %c0_0 = arith.constant 0 : index
    %0 = vector.load %arg1[%c0, %c0_0] : memref<16x128xf32, #tpu.memory_space<vmem>>, vector<16x128xf32>
    %1 = arith.truncf %0 : vector<16x128xf32> to vector<16x128xbf16>
    %c0_1 = arith.constant 0 : index
    %c0_2 = arith.constant 0 : index
    %2 = vector.load %arg2[%c0_1, %c0_2] : memref<128x128xbf16, #tpu.memory_space<vmem>>, vector<128x128xbf16>
    %cst = arith.constant dense<0.000000e+00> : vector<16x128xf32>
    %3 = tpu.matmul %1, %2, %cst {dimension_numbers = #tpu.dot_dimension_numbers<[1], [0], [0], [1], [0, 0, 1, 1], [], []>} : vector<16x128xbf16>, vector<128x128xbf16>, vector<16x128xf32> -> vector<16x128xf32>
    %c0_3 = arith.constant 0 : index
    %c0_4 = arith.constant 0 : index
    %4 = vector.load %arg3[%c0_3, %c0_4] : memref<1x128xf32, #tpu.memory_space<vmem>>, vector<1x128xf32>
    %5 = vector.broadcast %4 : vector<1x128xf32> to vector<16x128xf32>
    %6 = arith.addf %3, %5 : vector<16x128xf32>
    %cst_5 = arith.constant 0.000000e+00 : f32
    %7 = vector.broadcast %cst_5 : f32 to vector<16x128xf32>
    %8 = arith.subf %7, %6 : vector<16x128xf32>
    %9 = math.exp %8 : vector<16x128xf32>
    %cst_6 = arith.constant 1.000000e+00 : f32
    %10 = vector.broadcast %cst_6 : f32 to vector<16x128xf32>
    %11 = arith.addf %10, %9 : vector<16x128xf32>
    %12 = tpu.reciprocal %11 {approx = true} : vector<16x128xf32> -> vector<16x128xf32>
    %13 = arith.mulf %6, %12 : vector<16x128xf32>
    %14 = arith.truncf %13 : vector<16x128xf32> to vector<16x128xbf16>
    %c0_7 = arith.constant 0 : index
    %c0_8 = arith.constant 0 : index
    %15 = vector.load %arg4[%c0_7, %c0_8] : memref<128x128xbf16, #tpu.memory_space<vmem>>, vector<128x128xbf16>
    %cst_9 = arith.constant dense<0.000000e+00> : vector<16x128xf32>
    %16 = tpu.matmul %14, %15, %cst_9 {dimension_numbers = #tpu.dot_dimension_numbers<[1], [0], [0], [1], [0, 0, 1, 1], [], []>} : vector<16x128xbf16>, vector<128x128xbf16>, vector<16x128xf32> -> vector<16x128xf32>
    %c0_10 = arith.constant 0 : index
    %c0_11 = arith.constant 0 : index
    %17 = vector.load %arg5[%c0_10, %c0_11] : memref<1x128xf32, #tpu.memory_space<vmem>>, vector<1x128xf32>
    %18 = vector.broadcast %17 : vector<1x128xf32> to vector<16x128xf32>
    %19 = arith.addf %16, %18 : vector<16x128xf32>
    %cst_12 = arith.constant 0.000000e+00 : f32
    %20 = vector.broadcast %cst_12 : f32 to vector<16x128xf32>
    %21 = arith.subf %20, %19 : vector<16x128xf32>
    %22 = math.exp %21 : vector<16x128xf32>
    %cst_13 = arith.constant 1.000000e+00 : f32
    %23 = vector.broadcast %cst_13 : f32 to vector<16x128xf32>
    %24 = arith.addf %23, %22 : vector<16x128xf32>
    %25 = tpu.reciprocal %24 {approx = true} : vector<16x128xf32> -> vector<16x128xf32>
    %26 = arith.mulf %19, %25 : vector<16x128xf32>
    %27 = arith.truncf %26 : vector<16x128xf32> to vector<16x128xbf16>
    %c0_14 = arith.constant 0 : index
    %c0_15 = arith.constant 0 : index
    %28 = vector.load %arg6[%c0_14, %c0_15] : memref<128x128xbf16, #tpu.memory_space<vmem>>, vector<128x128xbf16>
    %cst_16 = arith.constant dense<0.000000e+00> : vector<16x128xf32>
    %29 = tpu.matmul %27, %28, %cst_16 {dimension_numbers = #tpu.dot_dimension_numbers<[1], [0], [0], [1], [0, 0, 1, 1], [], []>} : vector<16x128xbf16>, vector<128x128xbf16>, vector<16x128xf32> -> vector<16x128xf32>
    %c0_17 = arith.constant 0 : index
    %c0_18 = arith.constant 0 : index
    %30 = vector.load %arg7[%c0_17, %c0_18] : memref<1x128xf32, #tpu.memory_space<vmem>>, vector<1x128xf32>
    %31 = vector.broadcast %30 : vector<1x128xf32> to vector<16x128xf32>
    %32 = arith.addf %29, %31 : vector<16x128xf32>
    %cst_19 = arith.constant 0.000000e+00 : f32
    %33 = vector.broadcast %cst_19 : f32 to vector<16x128xf32>
    %34 = arith.subf %33, %32 : vector<16x128xf32>
    %35 = math.exp %34 : vector<16x128xf32>
    %cst_20 = arith.constant 1.000000e+00 : f32
    %36 = vector.broadcast %cst_20 : f32 to vector<16x128xf32>
    %37 = arith.addf %36, %35 : vector<16x128xf32>
    %38 = tpu.reciprocal %37 {approx = true} : vector<16x128xf32> -> vector<16x128xf32>
    %39 = arith.mulf %32, %38 : vector<16x128xf32>
    %40 = arith.truncf %39 : vector<16x128xf32> to vector<16x128xbf16>
    %c0_21 = arith.constant 0 : index
    %c0_22 = arith.constant 0 : index
    %41 = vector.load %arg8[%c0_21, %c0_22] : memref<16x128xbf16, #tpu.memory_space<vmem>>, vector<16x128xbf16>
    tpu.vector_store %arg8[%c0_21, %c0_22], %40 {strides = array<i32>} : memref<16x128xbf16, #tpu.memory_space<vmem>>, vector<16x128xbf16>,
    return
  }
  func.func @transform_0(%arg0: i32) -> (i32, i32) {
    %c0_i32 = arith.constant 0 : i32
    %c0_i32_0 = arith.constant 0 : i32
    return %arg0, %c0_i32 : i32, i32
  }
  func.func @transform_1(%arg0: i32) -> (i32, i32) {
    %c0_i32 = arith.constant 0 : i32
    %c0_i32_0 = arith.constant 0 : i32
    %c0_i32_1 = arith.constant 0 : i32
    return %c0_i32, %c0_i32_0 : i32, i32
  }
  func.func @transform_2(%arg0: i32) -> (i32, i32) {
    %c0_i32 = arith.constant 0 : i32
    %c0_i32_0 = arith.constant 0 : i32
    %c0_i32_1 = arith.constant 0 : i32
    return %c0_i32, %c0_i32_0 : i32, i32
  }
  func.func @transform_3(%arg0: i32) -> (i32, i32) {
    %c0_i32 = arith.constant 0 : i32
    %c0_i32_0 = arith.constant 0 : i32
    %c0_i32_1 = arith.constant 0 : i32
    return %c0_i32, %c0_i32_0 : i32, i32
  }
  func.func @transform_4(%arg0: i32) -> (i32, i32) {
    %c0_i32 = arith.constant 0 : i32
    %c0_i32_0 = arith.constant 0 : i32
    %c0_i32_1 = arith.constant 0 : i32
    return %c0_i32, %c0_i32_0 : i32, i32
  }
  func.func @transform_5(%arg0: i32) -> (i32, i32) {
    %c0_i32 = arith.constant 0 : i32
    %c0_i32_0 = arith.constant 0 : i32
    %c0_i32_1 = arith.constant 0 : i32
    return %c0_i32, %c0_i32_0 : i32, i32
  }
  func.func @transform_6(%arg0: i32) -> (i32, i32) {
    %c0_i32 = arith.constant 0 : i32
    %c0_i32_0 = arith.constant 0 : i32
    %c0_i32_1 = arith.constant 0 : i32
    return %c0_i32, %c0_i32_0 : i32, i32
  }
  func.func @transform_7(%arg0: i32) -> (i32, i32) {
    %c0_i32 = arith.constant 0 : i32
    %c0_i32_0 = arith.constant 0 : i32
    return %arg0, %c0_i32 : i32, i32
  }
}

module attributes {stable_mosaic.version = 11 : i64} {
  func.func @_mlp_kernel(%arg0: i32, %arg1: memref<16x128xf32, #tpu.memory_space<vmem>>, %arg2: memref<128x128xbf16, #tpu.memory_space<vmem>>, %arg3: memref<1x128xf32, #tpu.memory_space<vmem>>, %arg4: memref<128x128xbf16, #tpu.memory_space<vmem>>, %arg5: memref<1x128xf32, #tpu.memory_space<vmem>>, %arg6: memref<128x128xbf16, #tpu.memory_space<vmem>>, %arg7: memref<1x128xf32, #tpu.memory_space<vmem>>, %arg8: memref<16x128xbf16, #tpu.memory_space<vmem>>) attributes {dimension_semantics = [#tpu.dimension_semantics<parallel>], iteration_bounds = array<i64: 2>, scalar_prefetch = 0 : i64, scratch_operands = 0 : i64, tpu.core_type = #tpu.core_type<tc>, window_params = [{transform_indices = @transform_0, window_bounds = array<i64: 16, 128>}, {pipeline_mode = #tpu.pipeline_mode<synchronous>, transform_indices = @transform_1, window_bounds = array<i64: 128, 128>}, {pipeline_mode = #tpu.pipeline_mode<synchronous>, transform_indices = @transform_2, window_bounds = array<i64: 1, 128>}, {pipeline_mode = #tpu.pipeline_mode<synchronous>, transform_indices = @transform_3, window_bounds = array<i64: 128, 128>}, {pipeline_mode = #tpu.pipeline_mode<synchronous>, transform_indices = @transform_4, window_bounds = array<i64: 1, 128>}, {pipeline_mode = #tpu.pipeline_mode<synchronous>, transform_indices = @transform_5, window_bounds = array<i64: 128, 128>}, {pipeline_mode = #tpu.pipeline_mode<synchronous>, transform_indices = @transform_6, window_bounds = array<i64: 1, 128>}, {transform_indices = @transform_7, window_bounds = array<i64: 16, 128>}]} {
    %c0 = arith.constant 0 : index
    %c0_0 = arith.constant 0 : index
    %0 = vector.load %arg1[%c0, %c0_0] : memref<16x128xf32, #tpu.memory_space<vmem>>, vector<16x128xf32>
    %1 = arith.truncf %0 : vector<16x128xf32> to vector<16x128xbf16>
    %c0_1 = arith.constant 0 : index
    %c0_2 = arith.constant 0 : index
    %2 = vector.load %arg2[%c0_1, %c0_2] : memref<128x128xbf16, #tpu.memory_space<vmem>>, vector<128x128xbf16>
    %cst = arith.constant dense<0.000000e+00> : vector<16x128xf32>
    %3 = tpu.matmul %1, %2, %cst {dimension_numbers = #tpu.dot_dimension_numbers<[1], [0], [0], [1], [0, 0, 1, 1], [], []>} : vector<16x128xbf16>, vector<128x128xbf16>, vector<16x128xf32> -> vector<16x128xf32>
    %c0_3 = arith.constant 0 : index
    %c0_4 = arith.constant 0 : index
    %4 = vector.load %arg3[%c0_3, %c0_4] : memref<1x128xf32, #tpu.memory_space<vmem>>, vector<1x128xf32>
    %5 = vector.broadcast %4 : vector<1x128xf32> to vector<16x128xf32>
    %6 = arith.addf %3, %5 : vector<16x128xf32>
    %cst_5 = arith.constant 0.000000e+00 : f32
    %7 = vector.broadcast %cst_5 : f32 to vector<16x128xf32>
    %8 = arith.subf %7, %6 : vector<16x128xf32>
    %9 = math.exp %8 : vector<16x128xf32>
    %cst_6 = arith.constant 1.000000e+00 : f32
    %10 = vector.broadcast %cst_6 : f32 to vector<16x128xf32>
    %11 = arith.addf %10, %9 : vector<16x128xf32>
    %12 = tpu.reciprocal %11 {approx = true} : vector<16x128xf32> -> vector<16x128xf32>
    %13 = arith.mulf %6, %12 : vector<16x128xf32>
    %14 = arith.truncf %13 : vector<16x128xf32> to vector<16x128xbf16>
    %c0_7 = arith.constant 0 : index
    %c0_8 = arith.constant 0 : index
    %15 = vector.load %arg4[%c0_7, %c0_8] : memref<128x128xbf16, #tpu.memory_space<vmem>>, vector<128x128xbf16>
    %cst_9 = arith.constant dense<0.000000e+00> : vector<16x128xf32>
    %16 = tpu.matmul %14, %15, %cst_9 {dimension_numbers = #tpu.dot_dimension_numbers<[1], [0], [0], [1], [0, 0, 1, 1], [], []>} : vector<16x128xbf16>, vector<128x128xbf16>, vector<16x128xf32> -> vector<16x128xf32>
    %c0_10 = arith.constant 0 : index
    %c0_11 = arith.constant 0 : index
    %17 = vector.load %arg5[%c0_10, %c0_11] : memref<1x128xf32, #tpu.memory_space<vmem>>, vector<1x128xf32>
    %18 = vector.broadcast %17 : vector<1x128xf32> to vector<16x128xf32>
    %19 = arith.addf %16, %18 : vector<16x128xf32>
    %cst_12 = arith.constant 0.000000e+00 : f32
    %20 = vector.broadcast %cst_12 : f32 to vector<16x128xf32>
    %21 = arith.subf %20, %19 : vector<16x128xf32>
    %22 = math.exp %21 : vector<16x128xf32>
    %cst_13 = arith.constant 1.000000e+00 : f32
    %23 = vector.broadcast %cst_13 : f32 to vector<16x128xf32>
    %24 = arith.addf %23, %22 : vector<16x128xf32>
    %25 = tpu.reciprocal %24 {approx = true} : vector<16x128xf32> -> vector<16x128xf32>
    %26 = arith.mulf %19, %25 : vector<16x128xf32>
    %27 = arith.truncf %26 : vector<16x128xf32> to vector<16x128xbf16>
    %c0_14 = arith.constant 0 : index
    %c0_15 = arith.constant 0 : index
    %28 = vector.load %arg6[%c0_14, %c0_15] : memref<128x128xbf16, #tpu.memory_space<vmem>>, vector<128x128xbf16>
    %cst_16 = arith.constant dense<0.000000e+00> : vector<16x128xf32>
    %29 = tpu.matmul %27, %28, %cst_16 {dimension_numbers = #tpu.dot_dimension_numbers<[1], [0], [0], [1], [0, 0, 1, 1], [], []>} : vector<16x128xbf16>, vector<128x128xbf16>, vector<16x128xf32> -> vector<16x128xf32>
    %c0_17 = arith.constant 0 : index
    %c0_18 = arith.constant 0 : index
    %30 = vector.load %arg7[%c0_17, %c0_18] : memref<1x128xf32, #tpu.memory_space<vmem>>, vector<1x128xf32>
    %31 = vector.broadcast %30 : vector<1x128xf32> to vector<16x128xf32>
    %32 = arith.addf %29, %31 : vector<16x128xf32>
    %cst_19 = arith.constant 0.000000e+00 : f32
    %33 = vector.broadcast %cst_19 : f32 to vector<16x128xf32>
    %34 = arith.subf %33, %32 : vector<16x128xf32>
    %35 = math.exp %34 : vector<16x128xf32>
    %cst_20 = arith.constant 1.000000e+00 : f32
    %36 = vector.broadcast %cst_20 : f32 to vector<16x128xf32>
    %37 = arith.addf %36, %35 : vector<16x128xf32>
    %38 = tpu.reciprocal %37 {approx = true} : vector<16x128xf32> -> vector<16x128xf32>
    %39 = arith.mulf %32, %38 : vector<16x128xf32>
    %40 = arith.truncf %39 : vector<16x128xf32> to vector<16x128xbf16>
    %c0_21 = arith.constant 0 : index
    %c0_22 = arith.constant 0 : index
    %41 = vector.load %arg8[%c0_21, %c0_22] : memref<16x128xbf16, #tpu.memory_space<vmem>>, vector<16x128xbf16>
    tpu.vector_store %arg8[%c0_21, %c0_22], %40 {strides = array<i32>} : memref<16x128xbf16, #tpu.memory_space<vmem>>, vector<16x128xbf16>,
    return
  }
  func.func @transform_0(%arg0: i32) -> (i32, i32) {
    %c0_i32 = arith.constant 0 : i32
    %c0_i32_0 = arith.constant 0 : i32
    return %arg0, %c0_i32 : i32, i32
  }
  func.func @transform_1(%arg0: i32) -> (i32, i32) {
    %c0_i32 = arith.constant 0 : i32
    %c0_i32_0 = arith.constant 0 : i32
    %c0_i32_1 = arith.constant 0 : i32
    return %c0_i32, %c0_i32_0 : i32, i32
  }
  func.func @transform_2(%arg0: i32) -> (i32, i32) {
    %c0_i32 = arith.constant 0 : i32
    %c0_i32_0 = arith.constant 0 : i32
    %c0_i32_1 = arith.constant 0 : i32
    return %c0_i32, %c0_i32_0 : i32, i32
  }
  func.func @transform_3(%arg0: i32) -> (i32, i32) {
    %c0_i32 = arith.constant 0 : i32
    %c0_i32_0 = arith.constant 0 : i32
    %c0_i32_1 = arith.constant 0 : i32
    return %c0_i32, %c0_i32_0 : i32, i32
  }
  func.func @transform_4(%arg0: i32) -> (i32, i32) {
    %c0_i32 = arith.constant 0 : i32
    %c0_i32_0 = arith.constant 0 : i32
    %c0_i32_1 = arith.constant 0 : i32
    return %c0_i32, %c0_i32_0 : i32, i32
  }
  func.func @transform_5(%arg0: i32) -> (i32, i32) {
    %c0_i32 = arith.constant 0 : i32
    %c0_i32_0 = arith.constant 0 : i32
    %c0_i32_1 = arith.constant 0 : i32
    return %c0_i32, %c0_i32_0 : i32, i32
  }
  func.func @transform_6(%arg0: i32) -> (i32, i32) {
    %c0_i32 = arith.constant 0 : i32
    %c0_i32_0 = arith.constant 0 : i32
    %c0_i32_1 = arith.constant 0 : i32
    return %c0_i32, %c0_i32_0 : i32, i32
  }
  func.func @transform_7(%arg0: i32) -> (i32, i32) {
    %c0_i32 = arith.constant 0 : i32
    %c0_i32_0 = arith.constant 0 : i32
    return %arg0, %c0_i32 : i32, i32
  }
}

</mosaic_0001>

<bundles_post_ra>
// kernel: tpu_custom_call.1
= control target key start
LH: loop header
LB: loop body
LE: loop exit
PB: predicated region body
PF: predicated region fallthrough
CT: control target
= control target key end

     0   :  { %12 = vsyncpa [#allocation3], 0  ;;  %s1680_s0 = inlined_call_operand.hbm [shape: f32[32,128], index: 0, kind: input, shape index: {}]   ;;  %s1681_s1 = inlined_call_operand.hbm [shape: bf16[128,128], index: 1, kind: input, shape index: {}]   ;;  %s1682_s2 = inlined_call_operand.vmem [shape: f32[1,128], index: 2, kind: input, shape index: {}]   ;;  %s1683_s3 = inlined_call_operand.hbm [shape: bf16[128,128], index: 3, kind: input, shape index: {}]   ;;  %s1684_s4 = inlined_call_operand.vmem [shape: f32[1,128], index: 4, kind: input, shape index: {}]   ;;  %s1685_s5 = inlined_call_operand.hbm [shape: bf16[128,128], index: 5, kind: input, shape index: {}]   ;;  %s1686_s6 = inlined_call_operand.vmem [shape: f32[1,128], index: 6, kind: input, shape index: {}]   ;;  %s1687_s7 = inlined_call_operand.hbm [shape: bf16[32,128], index: 7, kind: output, shape index: {}]  }
   0x1   :  { %14 = vsyncpa [#allocation3 + $0x1], 0 }
   0x2   :  { %15 = vsyncpa [#allocation6], 0 }
   0x3   :  { %16 = vsyncpa [#allocation9], 0 }
   0x4   :  { %17 = vsyncpa [#allocation4], 0 }
   0x5   :  { %19 = vsyncpa [#allocation4 + $0x1], 0  ;;  %s1368_s24 = smov 0   ;;  %s1370_s25 = smov 0  }
   0x6   :  { %s1372_s26 = smov 0   ;;  %s1374_s27 = smov 0  }
   0x7 LB: > { %s1389_s28 = sadd.s32 4294967295, %s1313_s27   ;;  %s847_s29 = sadd.s32 4294967294, %s1313_s27   ;;  %s1313_s27 = sphi %s1374_s27, %s1713_s27   ;;  %s1309_s26 = sphi %s1372_s26, %s1712_s26   ;;  %s1305_s25 = sphi %s1370_s25, %s1711_s25   ;;  %s1301_s24 = sphi %s1368_s24, %s1710_s24  }
   0x8   : > { %p45_p0 = scmp.ne.s32.totalorder %s1305_s25, %s1301_s24  ;;  %p1688_p1 = scmp.eq.s32.totalorder %s1389_s28, 0 }
   0x9   : > { %p201_p3 = scmp.eq.s32.totalorder %s847_s29, 1  ;;  %p848_p5 = scmp.ge.s32.totalorder %s1313_s27, 1 }
   0xa   : > { %p1398_p4 = por %p1688_p1, %p45_p0  ;;  %p208_p7 = scmp.lt.s32.totalorder %s1313_s27, 3 }
   0xb   : > { %p1403_p6 = por %p201_p3, %p45_p0  ;;  %s1315_s10 = smov [#allocation5]  }
   0xc   : > { %s1692_s30 = scalar_select %p1398_p4, 1, 0 }
   0xd   : > { %s1693_s8 = scalar_select %p1403_p6, 1, 0 }
   0xe   : > { %p1408_p8 = pnand %p848_p5, %p208_p7  ;;  %s220_s11 = sshll.u32 %s1315_s10, 4  ;;  %s1412_s11 = int_to_ptr.vmem [resolvable:$true] %s220_s11 }
   0xf   : > { %1694 = sst [smem:[#allocation15_spill]] %s1693_s8  ;;  %s1316_s13 = smov [#allocation7]  }
  0x10   : > { %s1695_s9 = scalar_select %p1408_p8, 1, 0 }
  0x11   : > { %p1008_p9 = pneg %p1408_p8  ;;  %s236_s14 = sshll.u32 %s1316_s13, 4  ;;  %s1423_s14 = int_to_ptr.vmem [resolvable:$true] %s236_s14 }
  0x12   : > { %s1317_s15 = smov [#allocation8]   ;;  %s1125_s19 = scalar_lea.hbm %s1681_s1, 1024 }
  0x13   : > { %p1419_p11 = pnand %p1008_p9, %p1688_p1  ;;  %s1425_s16 = sshll.u32 %s1317_s15, 4  ;;  %s253_s16 = int_to_ptr.vmem [resolvable:$true] %s1425_s16 }
  0x14   : > { %p1126_p12 = scmp.ne.s32.totalorder %s1681_s1, %s1125_s19  ;;  %p1132_p5 = scmp.lt.u32.totalorder %s1125_s19, %s1681_s1 }
  0x15   : > { %p1435_p13 = pneg %p1419_p11 }
  0x17   : > { %p1128_p0 = pnand %p1435_p13, %p1126_p12 }
  0x19   : > { %p1129_p3 = pneg %p1128_p0 }
  0x1b   : > { %p1134_p7 = pnand %p1132_p5, %p1129_p3 }
  0x1d   : > { %1137 = shalt.err (!%p1134_p7)
}
  0x1e   : > { %s1138_s10 = scalar_lea.vmem %s1412_s11, 1024  ;;  %p1146_p2 = scmp.lt.s32.totalorder %s1412_s11, %s1412_s11 }
  0x1f   : > { %p1139_p9 = scmp.ne.s32.totalorder %s1412_s11, %s1138_s10  ;;  %p1147_p6 = scmp.lt.s32.totalorder %s1138_s10, %s1138_s10 }
  0x21   : > { %p1141_p10 = pnand %p1139_p9, %p1435_p13  ;;  %p1148_p12 = por %p1147_p6, %p1146_p2 }
  0x23   : > { %p1142_p1 = pneg %p1141_p10 }
  0x25   : > { %p1149_p0 = pnand %p1148_p12, %p1142_p1 }
  0x27   : > { %1152 = shalt.err (!%p1149_p0)
}
  0x28   : > { %s1318_s13 = smov 64   ;;  %s1319_s15 = smov 4  }
  0x29   : > { %1011 = dma.hbm_to_vmem [thread:$0]  (!%p1419_p11), %s1681_s1, 1024, %s1412_s11, [#allocation6], %s1318_s13, %s1318_s13, %s1319_s15  }
  0x2a   : > { %s1153_s21 = scalar_lea.hbm %s1683_s3, 1024 }
  0x2b   : > { %p1154_p1 = scmp.ne.s32.totalorder %s1683_s3, %s1153_s21  ;;  %p1160_p10 = scmp.lt.u32.totalorder %s1153_s21, %s1683_s3 }
  0x2d   : > { %p1156_p2 = pnand %p1154_p1, %p1435_p13 }
  0x2f   : > { %p1157_p6 = pneg %p1156_p2 }
  0x31   : > { %p1162_p3 = pnand %p1160_p10, %p1157_p6 }
  0x33   : > { %1165 = shalt.err (!%p1162_p3)
}
  0x34   : > { %s1166_s11 = scalar_lea.vmem %s1423_s14, 1024  ;;  %p1174_p12 = scmp.lt.s32.totalorder %s1423_s14, %s1423_s14 }
  0x35   : > { %p1167_p5 = scmp.ne.s32.totalorder %s1423_s14, %s1166_s11  ;;  %p1175_p0 = scmp.lt.s32.totalorder %s1166_s11, %s1166_s11 }
  0x37   : > { %p1169_p7 = pnand %p1167_p5, %p1435_p13  ;;  %p1176_p1 = por %p1175_p0, %p1174_p12 }
  0x39   : > { %p1170_p9 = pneg %p1169_p7 }
  0x3b   : > { %p1177_p2 = pnand %p1176_p1, %p1170_p9 }
  0x3d   : > { %1180 = shalt.err (!%p1177_p2)
}
  0x3e   : > { %1014 = dma.hbm_to_vmem [thread:$0]  (!%p1419_p11), %s1683_s3, 1024, %s1423_s14, [#allocation6], %s1318_s13, %s1318_s13, %s1319_s15  }
  0x3f   : > { %s1181_s20 = scalar_lea.hbm %s1685_s5, 1024 }
  0x40   : > { %p1182_p6 = scmp.ne.s32.totalorder %s1685_s5, %s1181_s20  ;;  %p1188_p5 = scmp.lt.u32.totalorder %s1181_s20, %s1685_s5 }
  0x42   : > { %p1184_p10 = pnand %p1182_p6, %p1435_p13 }
  0x44   : > { %p1185_p3 = pneg %p1184_p10 }
  0x46   : > { %p1190_p7 = pnand %p1188_p5, %p1185_p3 }
  0x48   : > { %1193 = shalt.err (!%p1190_p7)
}
  0x49   : > { %s1194_s11 = scalar_lea.vmem %s253_s16, 1024  ;;  %p1202_p1 = scmp.lt.s32.totalorder %s253_s16, %s253_s16 }
  0x4a   : > { %p1195_p9 = scmp.ne.s32.totalorder %s253_s16, %s1194_s11  ;;  %p1203_p2 = scmp.lt.s32.totalorder %s1194_s11, %s1194_s11 }
  0x4c   : > { %p1197_p12 = pnand %p1195_p9, %p1435_p13  ;;  %p1204_p4 = por %p1203_p2, %p1202_p1 }
  0x4e   : > { %p1198_p0 = pneg %p1197_p12 }
  0x50   : > { %p1205_p8 = pnand %p1204_p4, %p1198_p0 }
  0x52   : > { %1208 = shalt.err (!%p1205_p8)
}
  0x53   : > { %1017 = dma.hbm_to_vmem [thread:$0]  (!%p1419_p11), %s1685_s5, 1024, %s253_s16, [#allocation9], %s1318_s13, %s1318_s13, %s1319_s15  }
  0x54   : > { %s1508_s22 = sadd.s32 1, %s1313_s27   ;;  %s32_s17 = sadd.s32 1, %s1309_s26 }
  0x55   : > { %s29_s12 = ssub.s32 %s1313_s27, %s1508_s22  ;;  %p39_p8 = scmp.ne.s32.totalorder %s1309_s26, %s1305_s25 }
  0x56   : > { %p30_p4 = scmp.eq.s32.totalorder %s29_s12, 0  ;;  %p40_p13 = scmp.eq.s32.totalorder %s1313_s27, 0 }
  0x57   : > { %p1029_p6 = scmp.lt.s32.totalorder %s1313_s27, 2  ;;  %p1698_p3 = scmp.eq.s32.totalorder %s1389_s28, 1 }
  0x58   : > { %s1518_s18 = scalar_select %p30_p4, %s1309_s26, %s32_s17  }
  0x59   : > { %p41_p10 = por %p40_p13, %p39_p8  ;;  %p1522_p5 = por %p1698_p3, %p39_p8 }
  0x5a   : > { %s269_s20 = sand.u32 1, %s1309_s26   ;;  %s896_s21 = sshll.u32 %s1313_s27, 8 }
  0x5b   : > { %s853_s16 = sshll.u32 %s269_s20, 4  ;;  %s1531_s23 = scalar_lea.hbm %s1680_s0, %s896_s21 }
  0x5c   : > { %s273_s29 = scalar_lea.vmem [#allocation2], %s853_s16  ;;  %p1533_p11 = pnand %p1029_p6, %p41_p10 }
  0x5d   : > { %s280_s10 = sshll.u32 %s273_s29, 4  ;;  %s1539_s14 = scalar_lea.sflag [#allocation3], %s269_s20  ;;  %s1537_s10 = int_to_ptr.vmem [resolvable:$true] %s280_s10 }
  0x5e   : > { %s1209_s8 = scalar_lea.hbm %s1531_s23, 256  ;;  %p1211_p9 = pneg %p1533_p11 }
  0x5f   : > { %p1210_p7 = scmp.ne.s32.totalorder %s1531_s23, %s1209_s8  ;;  %s1214_s21 = scalar_lea.hbm %s1680_s0, 512 }
  0x60   : > { %p1215_p1 = scmp.lt.u32.totalorder %s1531_s23, %s1680_s0  ;;  %p1216_p2 = scmp.lt.u32.totalorder %s1214_s21, %s1209_s8 }
  0x61   : > { %p1212_p12 = pnand %p1211_p9, %p1210_p7  ;;  %p1218_p8 = scmp.lt.u32.totalorder %s1209_s8, %s1531_s23 }
  0x62   : > { %p1217_p4 = por %p1216_p2, %p1215_p1 }
  0x63   : > { %p1213_p0 = pneg %p1212_p12 }
  0x64   : > { %p1219_p13 = por %p1218_p8, %p1217_p4 }
  0x66   : > { %p1220_p6 = pnand %p1219_p13, %p1213_p0 }
  0x68   : > { %1223 = shalt.err (!%p1220_p6)
}
  0x69   : > { %s1224_s20 = scalar_lea.vmem %s1537_s10, 256  ;;  %s1320_s15 = smov [#allocation2]  }
  0x6a   : > { %p1225_p10 = scmp.ne.s32.totalorder %s1537_s10, %s1224_s20  ;;  %s1229_s29 = sshll.u32 %s1320_s15, 4  ;;  %s1230_s29 = int_to_ptr.vmem [resolvable:$false] %s1229_s29 }
  0x6b   : > { %s1231_s12 = scalar_lea.vmem %s1230_s29, 512  ;;  %p1232_p12 = scmp.lt.s32.totalorder %s1537_s10, %s1230_s29 }
  0x6c   : > { %p1227_p3 = pnand %p1225_p10, %p1211_p9  ;;  %p1233_p1 = scmp.lt.s32.totalorder %s1231_s12, %s1224_s20 }
  0x6e   : > { %p1228_p7 = pneg %p1227_p3  ;;  %p1234_p2 = por %p1233_p1, %p1232_p12 }
  0x70   : > { %p1235_p4 = pnand %p1234_p2, %p1228_p7 }
  0x72   : > { %1238 = shalt.err (!%p1235_p4)
}
  0x73   : > { %s1321_s8 = smov 128   ;;  %s1322_s17 = smov 8  }
  0x74   : > { %1021 = dma.hbm_to_vmem [thread:$0]  (!%p1533_p11), %s1531_s23, 256, %s1537_s10, %s1539_s14, %s1321_s8, %s1321_s8, %s1322_s17  }
  0x75   : > { %p1701_p9 = scmp.ne.s32.totalorder %s1695_s9, 0 }
  0x76   : > { %s1570_s21 = sand.u32 (!%p1701_p9), 1, %s1305_s25   ;;  %p1702_p0 = scmp.ne.s32.totalorder (!%p1701_p9), %s1692_s30, 0 }
  0x77   : > { %292 = sbr.rel (%p1701_p9) target bundleno = 927 (0x39f), region = 48  ;;  %s857_s16 = sshll.u32 (!%p1701_p9), %s1570_s21, 4 }
  0x78   : > { %s295_s13 = scalar_lea.sflag (!%p1701_p9), [#allocation3], %s1570_s21  ;;  %s1574_s20 = scalar_lea.vmem (!%p1701_p9), [#allocation2], %s857_s16 }
  0x7e   : > { %1284 = dma.done.wait (%p1702_p0), %s295_s13, 256  }
  0x7f   : > { %1286 = vsyncadd (%p1702_p0), %s295_s13, 4294967040  ;;  %p1703_p11 = scmp.eq.s32.totalorder %s1389_s28, 0 }
  0x81   : > { %1288 = dma.done.wait (%p1703_p11), [#allocation6], 2048   ;;  %p1704_p8 = pmov %p1703_p11 }
  0x83   : > { %1290 = vsyncadd (%p1704_p8), [#allocation6], 4294965248  ;;  %p1705_p13 = pmov %p1704_p8 }
  0x84   : > { %p1706_p6 = pmov %p1704_p8 }
  0x85   : > { %1292 = dma.done.wait (%p1705_p13), [#allocation9], 1024  }
  0x86   : > { %1294 = vsyncadd (%p1706_p6), [#allocation9], 4294966272  ;;  %v1323_v0 = vmov 0.0   ;;  %vm1324_vm0 = vmmov 0   ;;  %v1077_v1 = vld [vmem:[#allocation5] sm:$0xff]   ;;  %v1078_v2 = vld [vmem:[#allocation5 + $0x8] sm:$0xff]  }
  0x87   : > { %932 = vmatprep.subr.bf16.mxu0 %v1323_v0  ;;  %948 = vmatprep.mubr.msk.bf16.mxu0 %vm1324_vm0, %v1323_v0  ;;  %v1079_v3 = vld [vmem:[#allocation5 + $0x10] sm:$0xff]   ;;  %v1080_v4 = vld [vmem:[#allocation5 + $0x18] sm:$0xff]   ;;  %v1081_v5 = vld [vmem:[#allocation5 + $0x20] sm:$0xff]   ;;  %s861_s15 = sshll.u32 %s1570_s21, 3  ;;  %s899_s29 = sshll.u32 %s1389_s28, 7 }
  0x88   : > { %952 = vmatprep.subr.bf16.mxu1 %v1323_v0  ;;  %968 = vmatprep.mubr.msk.bf16.mxu1 %vm1324_vm0, %v1323_v0  ;;  %v1082_v6 = vld [vmem:[#allocation5 + $0x28] sm:$0xff]   ;;  %v1083_v7 = vld [vmem:[#allocation5 + $0x30] sm:$0xff]   ;;  %v1084_v8 = vld [vmem:[#allocation5 + $0x38] sm:$0xff]   ;;  %s340_s12 = scalar_lea.vmem [#allocation10], %s861_s15  ;;  %s1634_s13 = scalar_lea.hbm %s1687_s7, %s899_s29 }
  0x89   : > { %933 = vmatpush3.bf16.msra.mxu0 %v1077_v1  ;;  %v344_v9 = vld [vmem:[%s1574_s20] sm:$0xff]  ;;  %v345_v10 = vld [vmem:[%s1574_s20 + $0x8] sm:$0xff]  ;;  %s745_s8 = sshll.u32 %s340_s12, 4  ;;  %s732_s20 = scalar_lea.sflag [#allocation4], %s1570_s21  ;;  %s1636_s8 = int_to_ptr.vmem [resolvable:$true] %s745_s8 }
  0x8a   : > { %934 = vmatprep.subr.bf16.mxu0 %v1323_v0  ;;  %v346_v11 = vpack.c.bf16 %v345_v10, %v344_v9  ;;  %v1085_v12 = vld [vmem:[#allocation7] sm:$0xff]   ;;  %v1086_v13 = vld [vmem:[#allocation7 + $0x8] sm:$0xff]   ;;  %v1087_v14 = vld [vmem:[#allocation7 + $0x10] sm:$0xff]   ;;  %s1239_s30 = scalar_lea.vmem %s1636_s8, 128  ;;  %s1325_s28 = smov [#allocation10]  }
  0x8b   : > { %953 = vmatpush3.bf16.msra.mxu1 %v1085_v12  ;;  %v1088_v15 = vld [vmem:[#allocation7 + $0x18] sm:$0xff]   ;;  %v1089_v16 = vld [vmem:[#allocation7 + $0x20] sm:$0xff]   ;;  %v1090_v17 = vld [vmem:[#allocation7 + $0x28] sm:$0xff]   ;;  %p1240_p10 = scmp.ne.s32.totalorder %s1636_s8, %s1239_s30  ;;  %s1243_s9 = sshll.u32 %s1325_s28, 4  ;;  %s1244_s9 = int_to_ptr.vmem [resolvable:$false] %s1243_s9 }
  0x8c   : > { %954 = vmatprep.subr.bf16.mxu1 %v1323_v0  ;;  %v1091_v18 = vld [vmem:[#allocation7 + $0x30] sm:$0xff]   ;;  %v1092_v19 = vld [vmem:[#allocation7 + $0x38] sm:$0xff]   ;;  %v862_v20 = vld [vmem:[%s1682_s2] ss:$0 sm:$0xff]  ;;  %s1245_s23 = scalar_lea.vmem %s1244_s9, 256  ;;  %p1246_p12 = scmp.lt.s32.totalorder %s1636_s8, %s1244_s9 }
  0x8d   : > { %935 = vmatpush3.bf16.msra.mxu0 %v1078_v2  ;;  %v1093_v40 = vld [vmem:[#allocation8] sm:$0xff]   ;;  %v1094_v41 = vld [vmem:[#allocation8 + $0x8] sm:$0xff]   ;;  %v1095_v42 = vld [vmem:[#allocation8 + $0x10] sm:$0xff]   ;;  %p1241_p3 = pnand %p1240_p10, %p1522_p5  ;;  %p1247_p1 = scmp.lt.s32.totalorder %s1245_s23, %s1239_s30 }
  0x8e   : > { %936 = vmatprep.subr.bf16.mxu0 %v1323_v0  ;;  %v1096_v43 = vld [vmem:[#allocation8 + $0x18] sm:$0xff]   ;;  %v1097_v44 = vld [vmem:[#allocation8 + $0x20] sm:$0xff]   ;;  %v1098_v45 = vld [vmem:[#allocation8 + $0x28] sm:$0xff]  }
  0x8f   : > { %955 = vmatpush3.bf16.msra.mxu1 %v1086_v13  ;;  %v1099_v46 = vld [vmem:[#allocation8 + $0x30] sm:$0xff]   ;;  %v1100_v47 = vld [vmem:[#allocation8 + $0x38] sm:$0xff]   ;;  %v871_v48 = vld [vmem:[%s1684_s4] ss:$0 sm:$0xff]  ;;  %p1242_p7 = pneg %p1241_p3  ;;  %p1248_p2 = por %p1247_p1, %p1246_p12 }
  0x90   : > { %956 = vmatprep.subr.bf16.mxu1 %v1323_v0 }
  0x91   : > { %937 = vmatpush3.bf16.msra.mxu0 %v1079_v3  ;;  %p1249_p4 = pnand %p1248_p2, %p1242_p7 }
  0x92   : > { %938 = vmatprep.subr.bf16.mxu0 %v1323_v0 }
  0x93   : > { %957 = vmatpush3.bf16.msra.mxu1 %v1087_v14 }
  0x94   : > { %958 = vmatprep.subr.bf16.mxu1 %v1323_v0 }
  0x95   : > { %939 = vmatpush3.bf16.msra.mxu0 %v1080_v4  ;;  %v880_v4 = vld [vmem:[%s1686_s6] ss:$0 sm:$0xff] }
  0x96   : > { %940 = vmatprep.subr.bf16.mxu0 %v1323_v0 }
  0x97   : > { %959 = vmatpush3.bf16.msra.mxu1 %v1088_v15 }
  0x98   : > { %960 = vmatprep.subr.bf16.mxu1 %v1323_v0 }
  0x99   : > { %941 = vmatpush3.bf16.msra.mxu0 %v1081_v5 }
  0x9a   : > { %942 = vmatprep.subr.bf16.mxu0 %v1323_v0 }
  0x9b   : > { %961 = vmatpush3.bf16.msra.mxu1 %v1089_v16 }
  0x9c   : > { %962 = vmatprep.subr.bf16.mxu1 %v1323_v0 }
  0x9d   : > { %943 = vmatpush3.bf16.msra.mxu0 %v1082_v6 }
  0x9e   : > { %944 = vmatprep.subr.bf16.mxu0 %v1323_v0 }
  0x9f   : > { %963 = vmatpush3.bf16.msra.mxu1 %v1090_v17 }
  0xa0   : > { %964 = vmatprep.subr.bf16.mxu1 %v1323_v0 }
  0xa1   : > { %945 = vmatpush3.bf16.msra.mxu0 %v1083_v7 }
  0xa2   : > { %946 = vmatprep.subr.bf16.mxu0 %v1323_v0 }
  0xa3   : > { %965 = vmatpush3.bf16.msra.mxu1 %v1091_v18 }
  0xa4   : > { %966 = vmatprep.subr.bf16.mxu1 %v1323_v0 }
  0xa5   : > { %947 = vmatpush3.bf16.msra.mxu0 %v1084_v8 }
  0xa6   : > { %972 = vmatprep.subr.bf16.mxu0 %v1323_v0 }
  0xa7   : > { %967 = vmatpush3.bf16.msra.mxu1 %v1092_v19 }
  0xa8   : > { %949 = vmatmul.mubr.bf16.vlgmr.msra.gmra.mrb[0].mxu0 %v346_v11 }
  0xa9   : > { %988 = vmatprep.mubr.msk.bf16.mxu0 %vm1324_vm0, %v1323_v0  ;;  %973 = vmatpush3.bf16.msra.mxu0 %v1093_v40 }
  0xaa   : > { %974 = vmatprep.subr.bf16.mxu0 %v1323_v0 }
  0xad   : > { %975 = vmatpush3.bf16.msra.mxu0 %v1094_v41 }
  0xae   : > { %976 = vmatprep.subr.bf16.mxu0 %v1323_v0 }
  0xb1   : > { %977 = vmatpush3.bf16.msra.mxu0 %v1095_v42 }
  0xb2   : > { %978 = vmatprep.subr.bf16.mxu0 %v1323_v0 }
  0xb5   : > { %979 = vmatpush3.bf16.msra.mxu0 %v1096_v43 }
  0xb6   : > { %980 = vmatprep.subr.bf16.mxu0 %v1323_v0 }
  0xb9   : > { %981 = vmatpush3.bf16.msra.mxu0 %v1097_v44 }
  0xba   : > { %982 = vmatprep.subr.bf16.mxu0 %v1323_v0 }
  0xbd   : > { %983 = vmatpush3.bf16.msra.mxu0 %v1098_v45 }
  0xbe   : > { %984 = vmatprep.subr.bf16.mxu0 %v1323_v0 }
  0xc1   : > { %985 = vmatpush3.bf16.msra.mxu0 %v1099_v46 }
  0xc2   : > { %986 = vmatprep.subr.bf16.mxu0 %v1323_v0 }
  0xc5   : > { %987 = vmatpush3.bf16.msra.mxu0 %v1100_v47 }
 0x17b   : > { %v452_v21 = vpop.f32.mrb[0].mxu0 }
 0x17c   : > { %v453_v22 = vadd.f32 %v862_v20, %v452_v21  ;;  %v950_v23 = vpop.f32.mrb[1].mxu0 }
 0x17d   : > { %v455_v24 = vpop.f32.mrb[2].mxu0 }
 0x17e   : > { %v459_v25 = vsub.f32 0.0, %v453_v22  ;;  %v456_v26 = vadd.f32 %v862_v20, %v455_v24  ;;  %v951_v27 = vpop.f32.mrb[3].mxu0 }
 0x180   : > { %v461_v28 = vmul.f32 1.442695, %v459_v25  ;;  %v460_v29 = vsub.f32 0.0, %v456_v26 }
 0x182   : > { %1101 = vpow2.f32 %v461_v28  ;;  %v463_v30 = vmul.f32 1.442695, %v460_v29 }
 0x184   : > { %1103 = vpow2.f32 %v463_v30 }
 0x18c   : > { %v1102_v31 = vpop.eup %1101 }
 0x18d   : > { %v465_v32 = vadd.f32 1.0, %v1102_v31 }
 0x18e   : > { %v1104_v33 = vpop.eup %1103 }
 0x18f   : > { %1105 = vrcp.f32 %v465_v32  ;;  %v466_v34 = vadd.f32 1.0, %v1104_v33 }
 0x191   : > { %1107 = vrcp.f32 %v466_v34 }
 0x199   : > { %v1106_v35 = vpop.eup %1105 }
 0x19a   : > { %v469_v37 = vmul.f32 %v1106_v35, %v453_v22 }
 0x19b   : > { %v1108_v36 = vpop.eup %1107 }
 0x19c   : > { %v470_v38 = vmul.f32 %v1108_v36, %v456_v26 }
 0x19e   : > { %v471_v39 = vpack.c.bf16 %v470_v38, %v469_v37 }
 0x1a0   : > { %969 = vmatmul.mubr.bf16.vlgmr.msra.gmra.mrb[0].mxu1 %v471_v39 }
 0x273   : > { %v577_v49 = vpop.f32.mrb[0].mxu1 }
 0x274   : > { %v578_v50 = vadd.f32 %v871_v48, %v577_v49  ;;  %v970_v51 = vpop.f32.mrb[1].mxu1 }
 0x275   : > { %v580_v52 = vpop.f32.mrb[2].mxu1 }
 0x276   : > { %v584_v53 = vsub.f32 0.0, %v578_v50  ;;  %v581_v54 = vadd.f32 %v871_v48, %v580_v52  ;;  %v971_v55 = vpop.f32.mrb[3].mxu1 }
 0x278   : > { %v586_v56 = vmul.f32 1.442695, %v584_v53  ;;  %v585_v57 = vsub.f32 0.0, %v581_v54 }
 0x27a   : > { %1109 = vpow2.f32 %v586_v56  ;;  %v588_v58 = vmul.f32 1.442695, %v585_v57 }
 0x27c   : > { %1111 = vpow2.f32 %v588_v58 }
 0x284   : > { %v1110_v59 = vpop.eup %1109 }
 0x285   : > { %v590_v60 = vadd.f32 1.0, %v1110_v59 }
 0x286   : > { %v1112_v61 = vpop.eup %1111 }
 0x287   : > { %1113 = vrcp.f32 %v590_v60  ;;  %v591_v62 = vadd.f32 1.0, %v1112_v61 }
 0x289   : > { %1115 = vrcp.f32 %v591_v62 }
 0x291   : > { %v1114_v63 = vpop.eup %1113 }
 0x292   : > { %v594_v1 = vmul.f32 %v1114_v63, %v578_v50 }
 0x293   : > { %v1116_v0 = vpop.eup %1115 }
 0x294   : > { %v595_v2 = vmul.f32 %v1116_v0, %v581_v54 }
 0x296   : > { %v596_v3 = vpack.c.bf16 %v595_v2, %v594_v1 }
 0x298   : > { %989 = vmatmul.mubr.bf16.vlgmr.msra.gmra.mrb[4].mxu0 %v596_v3 }
 0x36b   : > { %v702_v5 = vpop.f32.mrb[4].mxu0 }
 0x36c   : > { %v703_v6 = vadd.f32 %v880_v4, %v702_v5  ;;  %v990_v7 = vpop.f32.mrb[5].mxu0 }
 0x36d   : > { %v705_v8 = vpop.f32.mrb[6].mxu0 }
 0x36e   : > { %v709_v9 = vsub.f32 0.0, %v703_v6  ;;  %v706_v10 = vadd.f32 %v880_v4, %v705_v8  ;;  %v991_v11 = vpop.f32.mrb[7].mxu0 }
 0x370   : > { %v711_v12 = vmul.f32 1.442695, %v709_v9  ;;  %v710_v13 = vsub.f32 0.0, %v706_v10 }
 0x372   : > { %1117 = vpow2.f32 %v711_v12  ;;  %v713_v14 = vmul.f32 1.442695, %v710_v13 }
 0x374   : > { %1119 = vpow2.f32 %v713_v14 }
 0x37c   : > { %v1118_v15 = vpop.eup %1117 }
 0x37d   : > { %v715_v16 = vadd.f32 1.0, %v1118_v15 }
 0x37e   : > { %v1120_v17 = vpop.eup %1119 }
 0x37f   : > { %1121 = vrcp.f32 %v715_v16  ;;  %v716_v18 = vadd.f32 1.0, %v1120_v17 }
 0x381   : > { %1123 = vrcp.f32 %v716_v18 }
 0x389   : > { %v1122_v19 = vpop.eup %1121 }
 0x38a   : > { %v719_v21 = vmul.f32 %v1122_v19, %v703_v6 }
 0x38b   : > { %v1124_v20 = vpop.eup %1123 }
 0x38c   : > { %v720_v22 = vmul.f32 %v1124_v20, %v706_v10 }
 0x38e   : > { %v903_v23 = vpack.c.bf16 %v720_v22, %v719_v21 }
 0x390   : > { %904 = vst [vmem:[%s340_s12] sm:$0xff] %v903_v23  }
 0x391   : > { %1252 = shalt.err (!%p1249_p4)
}
 0x392   : > { %s1253_s10 = scalar_lea.hbm %s1634_s13, 128  ;;  %s1257_s15 = scalar_lea.hbm %s1687_s7, 256 }
 0x393   : > { %p1254_p9 = scmp.ne.s32.totalorder %s1634_s13, %s1253_s10  ;;  %p1258_p8 = scmp.lt.u32.totalorder %s1634_s13, %s1687_s7 }
 0x394   : > { %p1259_p13 = scmp.lt.u32.totalorder %s1257_s15, %s1253_s10  ;;  %p1261_p10 = scmp.lt.u32.totalorder %s1253_s10, %s1634_s13 }
 0x395   : > { %p1255_p0 = pnand %p1254_p9, %p1522_p5 }
 0x396   : > { %p1260_p6 = por %p1259_p13, %p1258_p8 }
 0x397   : > { %p1256_p11 = pneg %p1255_p0 }
 0x398   : > { %p1262_p3 = por %p1261_p10, %p1260_p6 }
 0x39a   : > { %p1263_p7 = pnand %p1262_p3, %p1256_p11 }
 0x39c   : > { %1266 = shalt.err (!%p1263_p7)
}
 0x39d   : > { %s1326_s17 = smov 64   ;;  %s1327_s16 = smov 4  }
 0x39e   : > { %1006 = dma.vmem_to_hbm [thread:$0]  (%p1522_p5), %s1636_s8, 128, %s1634_s13, %s732_s20, %s1326_s17, %s1326_s17, %s1327_s16  }
 0x39f PF: > { %s1707_s30 = sld [smem:[#allocation15_spill]]  ;;  %s760_s28 = sand.u32 1, %s1301_s24  }
 0x3a0   : > { %p1709_p1 = scmp.ge.s32.totalorder %s1313_s27, 2  ;;  %s761_s9 = scalar_lea.sflag [#allocation4], %s760_s28 }
 0x3a5   : > { %p1708_p12 = scmp.ne.s32.totalorder %s1707_s30, 0 }
 0x3a7   : > { %p1023_p2 = pnand %p1709_p1, %p1708_p12 }
 0x3a9   : > { %1296 = dma.done.wait (!%p1023_p2), %s761_s9, 128  }
 0x3aa   : > { %1298 = vsyncadd (!%p1023_p2), %s761_s9, 4294967168  ;;  %p22_p4 = scmp.ge.s32.totalorder %s1508_s22, 4   ;;  %s1710_s24 = smov %s1305_s25 }
 0x3ab   : > { %s1711_s25 = smov %s1309_s26  ;;  %s1712_s26 = smov %s1518_s18 }
 0x3ac   : > { %s1713_s27 = smov %s1508_s22  ;;  %24 = sbr.rel (!%p22_p4) target bundleno = 7 (0x7), region = 105 }
 0x3b3   :  { %766 = vsyncpa [#allocation3], 1 }
 0x3b4   :  { %768 = vsyncpa [#allocation3 + $0x1], 1 }
 0x3b5   :  { %769 = vsyncpa [#allocation6], 1 }
 0x3b6   :  { %770 = vsyncpa [#allocation9], 1 }
 0x3b7   :  { %771 = vsyncpa [#allocation4], 1 }
 0x3b8   :  { %773 = vsyncpa [#allocation4 + $0x1], 1 }

// kernel: tpu_custom_call.1
= control target key start
LH: loop header
LB: loop body
LE: loop exit
PB: predicated region body
PF: predicated region fallthrough
CT: control target
= control target key end

     0   :  { %12 = vsyncpa [#allocation3], 0  ;;  %s1680_s0 = inlined_call_operand.hbm [shape: f32[32,128], index: 0, kind: input, shape index: {}]   ;;  %s1681_s1 = inlined_call_operand.hbm [shape: bf16[128,128], index: 1, kind: input, shape index: {}]   ;;  %s1682_s2 = inlined_call_operand.vmem [shape: f32[1,128], index: 2, kind: input, shape index: {}]   ;;  %s1683_s3 = inlined_call_operand.hbm [shape: bf16[128,128], index: 3, kind: input, shape index: {}]   ;;  %s1684_s4 = inlined_call_operand.vmem [shape: f32[1,128], index: 4, kind: input, shape index: {}]   ;;  %s1685_s5 = inlined_call_operand.hbm [shape: bf16[128,128], index: 5, kind: input, shape index: {}]   ;;  %s1686_s6 = inlined_call_operand.vmem [shape: f32[1,128], index: 6, kind: input, shape index: {}]   ;;  %s1687_s7 = inlined_call_operand.hbm [shape: bf16[32,128], index: 7, kind: output, shape index: {}]  }
   0x1   :  { %14 = vsyncpa [#allocation3 + $0x1], 0 }
   0x2   :  { %15 = vsyncpa [#allocation6], 0 }
   0x3   :  { %16 = vsyncpa [#allocation9], 0 }
   0x4   :  { %17 = vsyncpa [#allocation4], 0 }
   0x5   :  { %19 = vsyncpa [#allocation4 + $0x1], 0  ;;  %s1368_s24 = smov 0   ;;  %s1370_s25 = smov 0  }
   0x6   :  { %s1372_s26 = smov 0   ;;  %s1374_s27 = smov 0  }
   0x7 LB: > { %s1389_s28 = sadd.s32 4294967295, %s1313_s27   ;;  %s847_s29 = sadd.s32 4294967294, %s1313_s27   ;;  %s1313_s27 = sphi %s1374_s27, %s1713_s27   ;;  %s1309_s26 = sphi %s1372_s26, %s1712_s26   ;;  %s1305_s25 = sphi %s1370_s25, %s1711_s25   ;;  %s1301_s24 = sphi %s1368_s24, %s1710_s24  }
   0x8   : > { %p45_p0 = scmp.ne.s32.totalorder %s1305_s25, %s1301_s24  ;;  %p1688_p1 = scmp.eq.s32.totalorder %s1389_s28, 0 }
   0x9   : > { %p201_p3 = scmp.eq.s32.totalorder %s847_s29, 1  ;;  %p848_p5 = scmp.ge.s32.totalorder %s1313_s27, 1 }
   0xa   : > { %p1398_p4 = por %p1688_p1, %p45_p0  ;;  %p208_p7 = scmp.lt.s32.totalorder %s1313_s27, 3 }
   0xb   : > { %p1403_p6 = por %p201_p3, %p45_p0  ;;  %s1315_s10 = smov [#allocation5]  }
   0xc   : > { %s1692_s30 = scalar_select %p1398_p4, 1, 0 }
   0xd   : > { %s1693_s8 = scalar_select %p1403_p6, 1, 0 }
   0xe   : > { %p1408_p8 = pnand %p848_p5, %p208_p7  ;;  %s220_s11 = sshll.u32 %s1315_s10, 4  ;;  %s1412_s11 = int_to_ptr.vmem [resolvable:$true] %s220_s11 }
   0xf   : > { %1694 = sst [smem:[#allocation15_spill]] %s1693_s8  ;;  %s1316_s13 = smov [#allocation7]  }
  0x10   : > { %s1695_s9 = scalar_select %p1408_p8, 1, 0 }
  0x11   : > { %p1008_p9 = pneg %p1408_p8  ;;  %s236_s14 = sshll.u32 %s1316_s13, 4  ;;  %s1423_s14 = int_to_ptr.vmem [resolvable:$true] %s236_s14 }
  0x12   : > { %s1317_s15 = smov [#allocation8]   ;;  %s1125_s19 = scalar_lea.hbm %s1681_s1, 1024 }
  0x13   : > { %p1419_p11 = pnand %p1008_p9, %p1688_p1  ;;  %s1425_s16 = sshll.u32 %s1317_s15, 4  ;;  %s253_s16 = int_to_ptr.vmem [resolvable:$true] %s1425_s16 }
  0x14   : > { %p1126_p12 = scmp.ne.s32.totalorder %s1681_s1, %s1125_s19  ;;  %p1132_p5 = scmp.lt.u32.totalorder %s1125_s19, %s1681_s1 }
  0x15   : > { %p1435_p13 = pneg %p1419_p11 }
  0x17   : > { %p1128_p0 = pnand %p1435_p13, %p1126_p12 }
  0x19   : > { %p1129_p3 = pneg %p1128_p0 }
  0x1b   : > { %p1134_p7 = pnand %p1132_p5, %p1129_p3 }
  0x1d   : > { %1137 = shalt.err (!%p1134_p7)
}
  0x1e   : > { %s1138_s10 = scalar_lea.vmem %s1412_s11, 1024  ;;  %p1146_p2 = scmp.lt.s32.totalorder %s1412_s11, %s1412_s11 }
  0x1f   : > { %p1139_p9 = scmp.ne.s32.totalorder %s1412_s11, %s1138_s10  ;;  %p1147_p6 = scmp.lt.s32.totalorder %s1138_s10, %s1138_s10 }
  0x21   : > { %p1141_p10 = pnand %p1139_p9, %p1435_p13  ;;  %p1148_p12 = por %p1147_p6, %p1146_p2 }
  0x23   : > { %p1142_p1 = pneg %p1141_p10 }
  0x25   : > { %p1149_p0 = pnand %p1148_p12, %p1142_p1 }
  0x27   : > { %1152 = shalt.err (!%p1149_p0)
}
  0x28   : > { %s1318_s13 = smov 64   ;;  %s1319_s15 = smov 4  }
  0x29   : > { %1011 = dma.hbm_to_vmem [thread:$0]  (!%p1419_p11), %s1681_s1, 1024, %s1412_s11, [#allocation6], %s1318_s13, %s1318_s13, %s1319_s15  }
  0x2a   : > { %s1153_s21 = scalar_lea.hbm %s1683_s3, 1024 }
  0x2b   : > { %p1154_p1 = scmp.ne.s32.totalorder %s1683_s3, %s1153_s21  ;;  %p1160_p10 = scmp.lt.u32.totalorder %s1153_s21, %s1683_s3 }
  0x2d   : > { %p1156_p2 = pnand %p1154_p1, %p1435_p13 }
  0x2f   : > { %p1157_p6 = pneg %p1156_p2 }
  0x31   : > { %p1162_p3 = pnand %p1160_p10, %p1157_p6 }
  0x33   : > { %1165 = shalt.err (!%p1162_p3)
}
  0x34   : > { %s1166_s11 = scalar_lea.vmem %s1423_s14, 1024  ;;  %p1174_p12 = scmp.lt.s32.totalorder %s1423_s14, %s1423_s14 }
  0x35   : > { %p1167_p5 = scmp.ne.s32.totalorder %s1423_s14, %s1166_s11  ;;  %p1175_p0 = scmp.lt.s32.totalorder %s1166_s11, %s1166_s11 }
  0x37   : > { %p1169_p7 = pnand %p1167_p5, %p1435_p13  ;;  %p1176_p1 = por %p1175_p0, %p1174_p12 }
  0x39   : > { %p1170_p9 = pneg %p1169_p7 }
  0x3b   : > { %p1177_p2 = pnand %p1176_p1, %p1170_p9 }
  0x3d   : > { %1180 = shalt.err (!%p1177_p2)
}
  0x3e   : > { %1014 = dma.hbm_to_vmem [thread:$0]  (!%p1419_p11), %s1683_s3, 1024, %s1423_s14, [#allocation6], %s1318_s13, %s1318_s13, %s1319_s15  }
  0x3f   : > { %s1181_s20 = scalar_lea.hbm %s1685_s5, 1024 }
  0x40   : > { %p1182_p6 = scmp.ne.s32.totalorder %s1685_s5, %s1181_s20  ;;  %p1188_p5 = scmp.lt.u32.totalorder %s1181_s20, %s1685_s5 }
  0x42   : > { %p1184_p10 = pnand %p1182_p6, %p1435_p13 }
  0x44   : > { %p1185_p3 = pneg %p1184_p10 }
  0x46   : > { %p1190_p7 = pnand %p1188_p5, %p1185_p3 }
  0x48   : > { %1193 = shalt.err (!%p1190_p7)
}
  0x49   : > { %s1194_s11 = scalar_lea.vmem %s253_s16, 1024  ;;  %p1202_p1 = scmp.lt.s32.totalorder %s253_s16, %s253_s16 }
  0x4a   : > { %p1195_p9 = scmp.ne.s32.totalorder %s253_s16, %s1194_s11  ;;  %p1203_p2 = scmp.lt.s32.totalorder %s1194_s11, %s1194_s11 }
  0x4c   : > { %p1197_p12 = pnand %p1195_p9, %p1435_p13  ;;  %p1204_p4 = por %p1203_p2, %p1202_p1 }
  0x4e   : > { %p1198_p0 = pneg %p1197_p12 }
  0x50   : > { %p1205_p8 = pnand %p1204_p4, %p1198_p0 }
  0x52   : > { %1208 = shalt.err (!%p1205_p8)
}
  0x53   : > { %1017 = dma.hbm_to_vmem [thread:$0]  (!%p1419_p11), %s1685_s5, 1024, %s253_s16, [#allocation9], %s1318_s13, %s1318_s13, %s1319_s15  }
  0x54   : > { %s1508_s22 = sadd.s32 1, %s1313_s27   ;;  %s32_s17 = sadd.s32 1, %s1309_s26 }
  0x55   : > { %s29_s12 = ssub.s32 %s1313_s27, %s1508_s22  ;;  %p39_p8 = scmp.ne.s32.totalorder %s1309_s26, %s1305_s25 }
  0x56   : > { %p30_p4 = scmp.eq.s32.totalorder %s29_s12, 0  ;;  %p40_p13 = scmp.eq.s32.totalorder %s1313_s27, 0 }
  0x57   : > { %p1029_p6 = scmp.lt.s32.totalorder %s1313_s27, 2  ;;  %p1698_p3 = scmp.eq.s32.totalorder %s1389_s28, 1 }
  0x58   : > { %s1518_s18 = scalar_select %p30_p4, %s1309_s26, %s32_s17  }
  0x59   : > { %p41_p10 = por %p40_p13, %p39_p8  ;;  %p1522_p5 = por %p1698_p3, %p39_p8 }
  0x5a   : > { %s269_s20 = sand.u32 1, %s1309_s26   ;;  %s896_s21 = sshll.u32 %s1313_s27, 8 }
  0x5b   : > { %s853_s16 = sshll.u32 %s269_s20, 4  ;;  %s1531_s23 = scalar_lea.hbm %s1680_s0, %s896_s21 }
  0x5c   : > { %s273_s29 = scalar_lea.vmem [#allocation2], %s853_s16  ;;  %p1533_p11 = pnand %p1029_p6, %p41_p10 }
  0x5d   : > { %s280_s10 = sshll.u32 %s273_s29, 4  ;;  %s1539_s14 = scalar_lea.sflag [#allocation3], %s269_s20  ;;  %s1537_s10 = int_to_ptr.vmem [resolvable:$true] %s280_s10 }
  0x5e   : > { %s1209_s8 = scalar_lea.hbm %s1531_s23, 256  ;;  %p1211_p9 = pneg %p1533_p11 }
  0x5f   : > { %p1210_p7 = scmp.ne.s32.totalorder %s1531_s23, %s1209_s8  ;;  %s1214_s21 = scalar_lea.hbm %s1680_s0, 512 }
  0x60   : > { %p1215_p1 = scmp.lt.u32.totalorder %s1531_s23, %s1680_s0  ;;  %p1216_p2 = scmp.lt.u32.totalorder %s1214_s21, %s1209_s8 }
  0x61   : > { %p1212_p12 = pnand %p1211_p9, %p1210_p7  ;;  %p1218_p8 = scmp.lt.u32.totalorder %s1209_s8, %s1531_s23 }
  0x62   : > { %p1217_p4 = por %p1216_p2, %p1215_p1 }
  0x63   : > { %p1213_p0 = pneg %p1212_p12 }
  0x64   : > { %p1219_p13 = por %p1218_p8, %p1217_p4 }
  0x66   : > { %p1220_p6 = pnand %p1219_p13, %p1213_p0 }
  0x68   : > { %1223 = shalt.err (!%p1220_p6)
}
  0x69   : > { %s1224_s20 = scalar_lea.vmem %s1537_s10, 256  ;;  %s1320_s15 = smov [#allocation2]  }
  0x6a   : > { %p1225_p10 = scmp.ne.s32.totalorder %s1537_s10, %s1224_s20  ;;  %s1229_s29 = sshll.u32 %s1320_s15, 4  ;;  %s1230_s29 = int_to_ptr.vmem [resolvable:$false] %s1229_s29 }
  0x6b   : > { %s1231_s12 = scalar_lea.vmem %s1230_s29, 512  ;;  %p1232_p12 = scmp.lt.s32.totalorder %s1537_s10, %s1230_s29 }
  0x6c   : > { %p1227_p3 = pnand %p1225_p10, %p1211_p9  ;;  %p1233_p1 = scmp.lt.s32.totalorder %s1231_s12, %s1224_s20 }
  0x6e   : > { %p1228_p7 = pneg %p1227_p3  ;;  %p1234_p2 = por %p1233_p1, %p1232_p12 }
  0x70   : > { %p1235_p4 = pnand %p1234_p2, %p1228_p7 }
  0x72   : > { %1238 = shalt.err (!%p1235_p4)
}
  0x73   : > { %s1321_s8 = smov 128   ;;  %s1322_s17 = smov 8  }
  0x74   : > { %1021 = dma.hbm_to_vmem [thread:$0]  (!%p1533_p11), %s1531_s23, 256, %s1537_s10, %s1539_s14, %s1321_s8, %s1321_s8, %s1322_s17  }
  0x75   : > { %p1701_p9 = scmp.ne.s32.totalorder %s1695_s9, 0 }
  0x76   : > { %s1570_s21 = sand.u32 (!%p1701_p9), 1, %s1305_s25   ;;  %p1702_p0 = scmp.ne.s32.totalorder (!%p1701_p9), %s1692_s30, 0 }
  0x77   : > { %292 = sbr.rel (%p1701_p9) target bundleno = 927 (0x39f), region = 48  ;;  %s857_s16 = sshll.u32 (!%p1701_p9), %s1570_s21, 4 }
  0x78   : > { %s295_s13 = scalar_lea.sflag (!%p1701_p9), [#allocation3], %s1570_s21  ;;  %s1574_s20 = scalar_lea.vmem (!%p1701_p9), [#allocation2], %s857_s16 }
  0x7e   : > { %1284 = dma.done.wait (%p1702_p0), %s295_s13, 256  }
  0x7f   : > { %1286 = vsyncadd (%p1702_p0), %s295_s13, 4294967040  ;;  %p1703_p11 = scmp.eq.s32.totalorder %s1389_s28, 0 }
  0x81   : > { %1288 = dma.done.wait (%p1703_p11), [#allocation6], 2048   ;;  %p1704_p8 = pmov %p1703_p11 }
  0x83   : > { %1290 = vsyncadd (%p1704_p8), [#allocation6], 4294965248  ;;  %p1705_p13 = pmov %p1704_p8 }
  0x84   : > { %p1706_p6 = pmov %p1704_p8 }
  0x85   : > { %1292 = dma.done.wait (%p1705_p13), [#allocation9], 1024  }
  0x86   : > { %1294 = vsyncadd (%p1706_p6), [#allocation9], 4294966272  ;;  %v1323_v0 = vmov 0.0   ;;  %vm1324_vm0 = vmmov 0   ;;  %v1077_v1 = vld [vmem:[#allocation5] sm:$0xff]   ;;  %v1078_v2 = vld [vmem:[#allocation5 + $0x8] sm:$0xff]  }
  0x87   : > { %932 = vmatprep.subr.bf16.mxu0 %v1323_v0  ;;  %948 = vmatprep.mubr.msk.bf16.mxu0 %vm1324_vm0, %v1323_v0  ;;  %v1079_v3 = vld [vmem:[#allocation5 + $0x10] sm:$0xff]   ;;  %v1080_v4 = vld [vmem:[#allocation5 + $0x18] sm:$0xff]   ;;  %v1081_v5 = vld [vmem:[#allocation5 + $0x20] sm:$0xff]   ;;  %s861_s15 = sshll.u32 %s1570_s21, 3  ;;  %s899_s29 = sshll.u32 %s1389_s28, 7 }
  0x88   : > { %952 = vmatprep.subr.bf16.mxu1 %v1323_v0  ;;  %968 = vmatprep.mubr.msk.bf16.mxu1 %vm1324_vm0, %v1323_v0  ;;  %v1082_v6 = vld [vmem:[#allocation5 + $0x28] sm:$0xff]   ;;  %v1083_v7 = vld [vmem:[#allocation5 + $0x30] sm:$0xff]   ;;  %v1084_v8 = vld [vmem:[#allocation5 + $0x38] sm:$0xff]   ;;  %s340_s12 = scalar_lea.vmem [#allocation10], %s861_s15  ;;  %s1634_s13 = scalar_lea.hbm %s1687_s7, %s899_s29 }
  0x89   : > { %933 = vmatpush3.bf16.msra.mxu0 %v1077_v1  ;;  %v344_v9 = vld [vmem:[%s1574_s20] sm:$0xff]  ;;  %v345_v10 = vld [vmem:[%s1574_s20 + $0x8] sm:$0xff]  ;;  %s745_s8 = sshll.u32 %s340_s12, 4  ;;  %s732_s20 = scalar_lea.sflag [#allocation4], %s1570_s21  ;;  %s1636_s8 = int_to_ptr.vmem [resolvable:$true] %s745_s8 }
  0x8a   : > { %934 = vmatprep.subr.bf16.mxu0 %v1323_v0  ;;  %v346_v11 = vpack.c.bf16 %v345_v10, %v344_v9  ;;  %v1085_v12 = vld [vmem:[#allocation7] sm:$0xff]   ;;  %v1086_v13 = vld [vmem:[#allocation7 + $0x8] sm:$0xff]   ;;  %v1087_v14 = vld [vmem:[#allocation7 + $0x10] sm:$0xff]   ;;  %s1239_s30 = scalar_lea.vmem %s1636_s8, 128  ;;  %s1325_s28 = smov [#allocation10]  }
  0x8b   : > { %953 = vmatpush3.bf16.msra.mxu1 %v1085_v12  ;;  %v1088_v15 = vld [vmem:[#allocation7 + $0x18] sm:$0xff]   ;;  %v1089_v16 = vld [vmem:[#allocation7 + $0x20] sm:$0xff]   ;;  %v1090_v17 = vld [vmem:[#allocation7 + $0x28] sm:$0xff]   ;;  %p1240_p10 = scmp.ne.s32.totalorder %s1636_s8, %s1239_s30  ;;  %s1243_s9 = sshll.u32 %s1325_s28, 4  ;;  %s1244_s9 = int_to_ptr.vmem [resolvable:$false] %s1243_s9 }
  0x8c   : > { %954 = vmatprep.subr.bf16.mxu1 %v1323_v0  ;;  %v1091_v18 = vld [vmem:[#allocation7 + $0x30] sm:$0xff]   ;;  %v1092_v19 = vld [vmem:[#allocation7 + $0x38] sm:$0xff]   ;;  %v862_v20 = vld [vmem:[%s1682_s2] ss:$0 sm:$0xff]  ;;  %s1245_s23 = scalar_lea.vmem %s1244_s9, 256  ;;  %p1246_p12 = scmp.lt.s32.totalorder %s1636_s8, %s1244_s9 }
  0x8d   : > { %935 = vmatpush3.bf16.msra.mxu0 %v1078_v2  ;;  %v1093_v40 = vld [vmem:[#allocation8] sm:$0xff]   ;;  %v1094_v41 = vld [vmem:[#allocation8 + $0x8] sm:$0xff]   ;;  %v1095_v42 = vld [vmem:[#allocation8 + $0x10] sm:$0xff]   ;;  %p1241_p3 = pnand %p1240_p10, %p1522_p5  ;;  %p1247_p1 = scmp.lt.s32.totalorder %s1245_s23, %s1239_s30 }
  0x8e   : > { %936 = vmatprep.subr.bf16.mxu0 %v1323_v0  ;;  %v1096_v43 = vld [vmem:[#allocation8 + $0x18] sm:$0xff]   ;;  %v1097_v44 = vld [vmem:[#allocation8 + $0x20] sm:$0xff]   ;;  %v1098_v45 = vld [vmem:[#allocation8 + $0x28] sm:$0xff]  }
  0x8f   : > { %955 = vmatpush3.bf16.msra.mxu1 %v1086_v13  ;;  %v1099_v46 = vld [vmem:[#allocation8 + $0x30] sm:$0xff]   ;;  %v1100_v47 = vld [vmem:[#allocation8 + $0x38] sm:$0xff]   ;;  %v871_v48 = vld [vmem:[%s1684_s4] ss:$0 sm:$0xff]  ;;  %p1242_p7 = pneg %p1241_p3  ;;  %p1248_p2 = por %p1247_p1, %p1246_p12 }
  0x90   : > { %956 = vmatprep.subr.bf16.mxu1 %v1323_v0 }
  0x91   : > { %937 = vmatpush3.bf16.msra.mxu0 %v1079_v3  ;;  %p1249_p4 = pnand %p1248_p2, %p1242_p7 }
  0x92   : > { %938 = vmatprep.subr.bf16.mxu0 %v1323_v0 }
  0x93   : > { %957 = vmatpush3.bf16.msra.mxu1 %v1087_v14 }
  0x94   : > { %958 = vmatprep.subr.bf16.mxu1 %v1323_v0 }
  0x95   : > { %939 = vmatpush3.bf16.msra.mxu0 %v1080_v4  ;;  %v880_v4 = vld [vmem:[%s1686_s6] ss:$0 sm:$0xff] }
  0x96   : > { %940 = vmatprep.subr.bf16.mxu0 %v1323_v0 }
  0x97   : > { %959 = vmatpush3.bf16.msra.mxu1 %v1088_v15 }
  0x98   : > { %960 = vmatprep.subr.bf16.mxu1 %v1323_v0 }
  0x99   : > { %941 = vmatpush3.bf16.msra.mxu0 %v1081_v5 }
  0x9a   : > { %942 = vmatprep.subr.bf16.mxu0 %v1323_v0 }
  0x9b   : > { %961 = vmatpush3.bf16.msra.mxu1 %v1089_v16 }
  0x9c   : > { %962 = vmatprep.subr.bf16.mxu1 %v1323_v0 }
  0x9d   : > { %943 = vmatpush3.bf16.msra.mxu0 %v1082_v6 }
  0x9e   : > { %944 = vmatprep.subr.bf16.mxu0 %v1323_v0 }
  0x9f   : > { %963 = vmatpush3.bf16.msra.mxu1 %v1090_v17 }
  0xa0   : > { %964 = vmatprep.subr.bf16.mxu1 %v1323_v0 }
  0xa1   : > { %945 = vmatpush3.bf16.msra.mxu0 %v1083_v7 }
  0xa2   : > { %946 = vmatprep.subr.bf16.mxu0 %v1323_v0 }
  0xa3   : > { %965 = vmatpush3.bf16.msra.mxu1 %v1091_v18 }
  0xa4   : > { %966 = vmatprep.subr.bf16.mxu1 %v1323_v0 }
  0xa5   : > { %947 = vmatpush3.bf16.msra.mxu0 %v1084_v8 }
  0xa6   : > { %972 = vmatprep.subr.bf16.mxu0 %v1323_v0 }
  0xa7   : > { %967 = vmatpush3.bf16.msra.mxu1 %v1092_v19 }
  0xa8   : > { %949 = vmatmul.mubr.bf16.vlgmr.msra.gmra.mrb[0].mxu0 %v346_v11 }
  0xa9   : > { %988 = vmatprep.mubr.msk.bf16.mxu0 %vm1324_vm0, %v1323_v0  ;;  %973 = vmatpush3.bf16.msra.mxu0 %v1093_v40 }
  0xaa   : > { %974 = vmatprep.subr.bf16.mxu0 %v1323_v0 }
  0xad   : > { %975 = vmatpush3.bf16.msra.mxu0 %v1094_v41 }
  0xae   : > { %976 = vmatprep.subr.bf16.mxu0 %v1323_v0 }
  0xb1   : > { %977 = vmatpush3.bf16.msra.mxu0 %v1095_v42 }
  0xb2   : > { %978 = vmatprep.subr.bf16.mxu0 %v1323_v0 }
  0xb5   : > { %979 = vmatpush3.bf16.msra.mxu0 %v1096_v43 }
  0xb6   : > { %980 = vmatprep.subr.bf16.mxu0 %v1323_v0 }
  0xb9   : > { %981 = vmatpush3.bf16.msra.mxu0 %v1097_v44 }
  0xba   : > { %982 = vmatprep.subr.bf16.mxu0 %v1323_v0 }
  0xbd   : > { %983 = vmatpush3.bf16.msra.mxu0 %v1098_v45 }
  0xbe   : > { %984 = vmatprep.subr.bf16.mxu0 %v1323_v0 }
  0xc1   : > { %985 = vmatpush3.bf16.msra.mxu0 %v1099_v46 }
  0xc2   : > { %986 = vmatprep.subr.bf16.mxu0 %v1323_v0 }
  0xc5   : > { %987 = vmatpush3.bf16.msra.mxu0 %v1100_v47 }
 0x17b   : > { %v452_v21 = vpop.f32.mrb[0].mxu0 }
 0x17c   : > { %v453_v22 = vadd.f32 %v862_v20, %v452_v21  ;;  %v950_v23 = vpop.f32.mrb[1].mxu0 }
 0x17d   : > { %v455_v24 = vpop.f32.mrb[2].mxu0 }
 0x17e   : > { %v459_v25 = vsub.f32 0.0, %v453_v22  ;;  %v456_v26 = vadd.f32 %v862_v20, %v455_v24  ;;  %v951_v27 = vpop.f32.mrb[3].mxu0 }
 0x180   : > { %v461_v28 = vmul.f32 1.442695, %v459_v25  ;;  %v460_v29 = vsub.f32 0.0, %v456_v26 }
 0x182   : > { %1101 = vpow2.f32 %v461_v28  ;;  %v463_v30 = vmul.f32 1.442695, %v460_v29 }
 0x184   : > { %1103 = vpow2.f32 %v463_v30 }
 0x18c   : > { %v1102_v31 = vpop.eup %1101 }
 0x18d   : > { %v465_v32 = vadd.f32 1.0, %v1102_v31 }
 0x18e   : > { %v1104_v33 = vpop.eup %1103 }
 0x18f   : > { %1105 = vrcp.f32 %v465_v32  ;;  %v466_v34 = vadd.f32 1.0, %v1104_v33 }
 0x191   : > { %1107 = vrcp.f32 %v466_v34 }
 0x199   : > { %v1106_v35 = vpop.eup %1105 }
 0x19a   : > { %v469_v37 = vmul.f32 %v1106_v35, %v453_v22 }
 0x19b   : > { %v1108_v36 = vpop.eup %1107 }
 0x19c   : > { %v470_v38 = vmul.f32 %v1108_v36, %v456_v26 }
 0x19e   : > { %v471_v39 = vpack.c.bf16 %v470_v38, %v469_v37 }
 0x1a0   : > { %969 = vmatmul.mubr.bf16.vlgmr.msra.gmra.mrb[0].mxu1 %v471_v39 }
 0x273   : > { %v577_v49 = vpop.f32.mrb[0].mxu1 }
 0x274   : > { %v578_v50 = vadd.f32 %v871_v48, %v577_v49  ;;  %v970_v51 = vpop.f32.mrb[1].mxu1 }
 0x275   : > { %v580_v52 = vpop.f32.mrb[2].mxu1 }
 0x276   : > { %v584_v53 = vsub.f32 0.0, %v578_v50  ;;  %v581_v54 = vadd.f32 %v871_v48, %v580_v52  ;;  %v971_v55 = vpop.f32.mrb[3].mxu1 }
 0x278   : > { %v586_v56 = vmul.f32 1.442695, %v584_v53  ;;  %v585_v57 = vsub.f32 0.0, %v581_v54 }
 0x27a   : > { %1109 = vpow2.f32 %v586_v56  ;;  %v588_v58 = vmul.f32 1.442695, %v585_v57 }
 0x27c   : > { %1111 = vpow2.f32 %v588_v58 }
 0x284   : > { %v1110_v59 = vpop.eup %1109 }
 0x285   : > { %v590_v60 = vadd.f32 1.0, %v1110_v59 }
 0x286   : > { %v1112_v61 = vpop.eup %1111 }
 0x287   : > { %1113 = vrcp.f32 %v590_v60  ;;  %v591_v62 = vadd.f32 1.0, %v1112_v61 }
 0x289   : > { %1115 = vrcp.f32 %v591_v62 }
 0x291   : > { %v1114_v63 = vpop.eup %1113 }
 0x292   : > { %v594_v1 = vmul.f32 %v1114_v63, %v578_v50 }
 0x293   : > { %v1116_v0 = vpop.eup %1115 }
 0x294   : > { %v595_v2 = vmul.f32 %v1116_v0, %v581_v54 }
 0x296   : > { %v596_v3 = vpack.c.bf16 %v595_v2, %v594_v1 }
 0x298   : > { %989 = vmatmul.mubr.bf16.vlgmr.msra.gmra.mrb[4].mxu0 %v596_v3 }
 0x36b   : > { %v702_v5 = vpop.f32.mrb[4].mxu0 }
 0x36c   : > { %v703_v6 = vadd.f32 %v880_v4, %v702_v5  ;;  %v990_v7 = vpop.f32.mrb[5].mxu0 }
 0x36d   : > { %v705_v8 = vpop.f32.mrb[6].mxu0 }
 0x36e   : > { %v709_v9 = vsub.f32 0.0, %v703_v6  ;;  %v706_v10 = vadd.f32 %v880_v4, %v705_v8  ;;  %v991_v11 = vpop.f32.mrb[7].mxu0 }
 0x370   : > { %v711_v12 = vmul.f32 1.442695, %v709_v9  ;;  %v710_v13 = vsub.f32 0.0, %v706_v10 }
 0x372   : > { %1117 = vpow2.f32 %v711_v12  ;;  %v713_v14 = vmul.f32 1.442695, %v710_v13 }
 0x374   : > { %1119 = vpow2.f32 %v713_v14 }
 0x37c   : > { %v1118_v15 = vpop.eup %1117 }
 0x37d   : > { %v715_v16 = vadd.f32 1.0, %v1118_v15 }
 0x37e   : > { %v1120_v17 = vpop.eup %1119 }
 0x37f   : > { %1121 = vrcp.f32 %v715_v16  ;;  %v716_v18 = vadd.f32 1.0, %v1120_v17 }
 0x381   : > { %1123 = vrcp.f32 %v716_v18 }
 0x389   : > { %v1122_v19 = vpop.eup %1121 }
 0x38a   : > { %v719_v21 = vmul.f32 %v1122_v19, %v703_v6 }
 0x38b   : > { %v1124_v20 = vpop.eup %1123 }
 0x38c   : > { %v720_v22 = vmul.f32 %v1124_v20, %v706_v10 }
 0x38e   : > { %v903_v23 = vpack.c.bf16 %v720_v22, %v719_v21 }
 0x390   : > { %904 = vst [vmem:[%s340_s12] sm:$0xff] %v903_v23  }
 0x391   : > { %1252 = shalt.err (!%p1249_p4)
}
 0x392   : > { %s1253_s10 = scalar_lea.hbm %s1634_s13, 128  ;;  %s1257_s15 = scalar_lea.hbm %s1687_s7, 256 }
 0x393   : > { %p1254_p9 = scmp.ne.s32.totalorder %s1634_s13, %s1253_s10  ;;  %p1258_p8 = scmp.lt.u32.totalorder %s1634_s13, %s1687_s7 }
 0x394   : > { %p1259_p13 = scmp.lt.u32.totalorder %s1257_s15, %s1253_s10  ;;  %p1261_p10 = scmp.lt.u32.totalorder %s1253_s10, %s1634_s13 }
 0x395   : > { %p1255_p0 = pnand %p1254_p9, %p1522_p5 }
 0x396   : > { %p1260_p6 = por %p1259_p13, %p1258_p8 }
 0x397   : > { %p1256_p11 = pneg %p1255_p0 }
 0x398   : > { %p1262_p3 = por %p1261_p10, %p1260_p6 }
 0x39a   : > { %p1263_p7 = pnand %p1262_p3, %p1256_p11 }
 0x39c   : > { %1266 = shalt.err (!%p1263_p7)
}
 0x39d   : > { %s1326_s17 = smov 64   ;;  %s1327_s16 = smov 4  }
 0x39e   : > { %1006 = dma.vmem_to_hbm [thread:$0]  (%p1522_p5), %s1636_s8, 128, %s1634_s13, %s732_s20, %s1326_s17, %s1326_s17, %s1327_s16  }
 0x39f PF: > { %s1707_s30 = sld [smem:[#allocation15_spill]]  ;;  %s760_s28 = sand.u32 1, %s1301_s24  }
 0x3a0   : > { %p1709_p1 = scmp.ge.s32.totalorder %s1313_s27, 2  ;;  %s761_s9 = scalar_lea.sflag [#allocation4], %s760_s28 }
 0x3a5   : > { %p1708_p12 = scmp.ne.s32.totalorder %s1707_s30, 0 }
 0x3a7   : > { %p1023_p2 = pnand %p1709_p1, %p1708_p12 }
 0x3a9   : > { %1296 = dma.done.wait (!%p1023_p2), %s761_s9, 128  }
 0x3aa   : > { %1298 = vsyncadd (!%p1023_p2), %s761_s9, 4294967168  ;;  %p22_p4 = scmp.ge.s32.totalorder %s1508_s22, 4   ;;  %s1710_s24 = smov %s1305_s25 }
 0x3ab   : > { %s1711_s25 = smov %s1309_s26  ;;  %s1712_s26 = smov %s1518_s18 }
 0x3ac   : > { %s1713_s27 = smov %s1508_s22  ;;  %24 = sbr.rel (!%p22_p4) target bundleno = 7 (0x7), region = 105 }
 0x3b3   :  { %766 = vsyncpa [#allocation3], 1 }
 0x3b4   :  { %768 = vsyncpa [#allocation3 + $0x1], 1 }
 0x3b5   :  { %769 = vsyncpa [#allocation6], 1 }
 0x3b6   :  { %770 = vsyncpa [#allocation9], 1 }
 0x3b7   :  { %771 = vsyncpa [#allocation4], 1 }
 0x3b8   :  { %773 = vsyncpa [#allocation4 + $0x1], 1 }

</bundles_post_ra>
